<compile_context>
chip_gen: v7x
topology: tpu7x:2x2x1
jax: 0.10.0
libtpu: 0.0.40
codegen_flags: <defaults>
</compile_context>

<pallas_src>
import jax
import jax.numpy as jnp
from jax.experimental import pallas as pl
from jax.experimental.pallas import tpu as pltpu


def skipgram_logp_kernel(center_ref, target_ids_ref, outer_ids_ref, emb_u_t_ref, out_ref):
    """center_ref: (TB, D) f32, target_ids_ref: (TB, 1) i32,
    outer_ids_ref: (TB, V) i32, emb_u_t_ref: (D, Vocab) f32, out_ref: (TB, 128) f32."""
    c = center_ref[...]                       # (TB, D)
    u_t = emb_u_t_ref[...]                    # (D, Vocab)
    tb = c.shape[0]
    vocab = u_t.shape[1]

    # All <emb_u[w], center[b]> dot products in a single MXU matmul.
    full_scores = jnp.dot(c, u_t, preferred_element_type=jnp.float32)   # (TB, Vocab)

    vocab_iota = jax.lax.broadcasted_iota(jnp.int32, (tb, vocab), 1)

    # scores[b] = <emb_u[target[b]], center[b]> via one-hot select from full_scores.
    tgt_onehot = (vocab_iota == target_ids_ref[...]).astype(jnp.float32)       # (TB, Vocab)
    scores = jnp.sum(tgt_onehot * full_scores, axis=-1, keepdims=True)         # (TB, 1)

    # counts[b, w] = multiplicity of w in outer_words[b, :].  V is small & static,
    # so a fully unrolled compare+add keeps everything 2-D and VPU-friendly.
    # TODO(synk): for vocab-scale outer sets replace the one-hot/counts trick with a
    # PrefetchScalarGridSpec DMA gather of emb_u rows per tile.
    outer_ids = outer_ids_ref[...]                                             # (TB, V)
    num_outer = outer_ids.shape[1]
    counts = jnp.zeros((tb, vocab), jnp.float32)
    for v in range(num_outer):
        counts = counts + (vocab_iota == outer_ids[:, v:v + 1]).astype(jnp.float32)

    # Stabilized log-sum-exp over the outer set (with multiplicity).
    masked = jnp.where(counts > 0.0, full_scores, -jnp.inf)                    # (TB, Vocab)
    m = jnp.max(masked, axis=-1, keepdims=True)                                # (TB, 1)
    denom = jnp.sum(counts * jnp.exp(masked - m), axis=-1, keepdims=True)      # (TB, 1)
    log_denom = m + jnp.log(denom)

    # log P_oc[b] = scores[b] - logsumexp_v(norm_scores[b, v])
    log_p = scores - log_denom                                                 # (TB, 1)

    # Lane-dense store (full (TB, 128) block, unmasked); wrapper reads column 0.
    out_ref[...] = jnp.broadcast_to(log_p, out_ref.shape)


def skipgram_forward(emb_v, emb_u, center_words, target_words, outer_words, *, tb=8):
    """Glue: tiny center gather + pallas_call. Returns scalar NLL (f32)."""
    B = center_words.shape[0]
    vocab, D = emb_u.shape
    V = outer_words.shape[1]
    assert B % tb == 0, "batch must be a multiple of the batch tile size"
    num_tiles = B // tb

    # Only the small (B, D) center gather stays in the wrapper; the embedding_u
    # lookups are fused into the kernel via the center @ emb_u^T matmul.
    center = emb_v[center_words[:, 0]].astype(jnp.float32)        # (B, D)
    emb_u_t = emb_u.T.astype(jnp.float32)                         # (D, Vocab), VMEM-resident

    # VMEM per step (double-buffered) ~= 2*(TB*D + D*Vocab + TB*128)*4B — well under the
    # 32 MiB default scoped limit here; re-derive TB (or set vmem_limit_bytes) for
    # v7x's 64 MiB physical VMEM when D*Vocab gets large.
    log_p = pl.pallas_call(
        skipgram_logp_kernel,
        out_shape=jax.ShapeDtypeStruct((B, 128), jnp.float32),
        grid=(num_tiles,),
        in_specs=[
            pl.BlockSpec((tb, D), lambda i: (i, 0)),          # center tile
            pl.BlockSpec((tb, 1), lambda i: (i, 0)),          # target ids tile
            pl.BlockSpec((tb, V), lambda i: (i, 0)),          # outer ids tile
            pl.BlockSpec((D, vocab), lambda i: (0, 0)),       # emb_u^T, resident in VMEM
        ],
        out_specs=pl.BlockSpec((tb, 128), lambda i: (i, 0)),
        compiler_params=pltpu.CompilerParams(
            dimension_semantics=("parallel",),                # shardable across v7x TCs
        ),
    )(center, target_words.astype(jnp.int32),
      outer_words.astype(jnp.int32), emb_u_t)

    # nll = -mean(log(P_oc)); final tiny reduction in the JAX wrapper.
    return -jnp.mean(log_p[:, 0])


def reference_forward(emb_v, emb_u, center_words, target_words, outer_words):
    """Pure-JAX reference mirroring the PyTorch module exactly."""
    center_embeds = emb_v[center_words]          # (B, 1, D)
    target_embeds = emb_u[target_words]          # (B, 1, D)
    outer_embeds = emb_u[outer_words]            # (B, V, D)
    scores = jnp.sum(target_embeds * center_embeds, axis=-1)        # (B, 1)
    norm_scores = jnp.sum(outer_embeds * center_embeds, axis=-1)    # (B, V)
    p_oc = jnp.exp(scores) / jnp.sum(jnp.exp(norm_scores), axis=1, keepdims=True)
    return -jnp.mean(jnp.log(p_oc))


if __name__ == "__main__":
    # Small, deterministic setup.
    vocab_size = 64
    emb_dim = 128     # D (lane axis)
    batch = 16        # B -> two 8-row tiles, grid=(2,)
    num_outer = 8     # V (context / negative samples per example)

    key = jax.random.PRNGKey(0)
    k1, k2, k3, k4, k5 = jax.random.split(key, 5)

    # Deterministic synthetic weights (the module's init_emb is buggy in the original
    # source, so we just use a uniform init here).
    initrange = 0.5 / emb_dim
    emb_v = jax.random.uniform(k1, (vocab_size, emb_dim), jnp.float32,
                               minval=-initrange, maxval=initrange)
    emb_u = jax.random.uniform(k2, (vocab_size, emb_dim), jnp.float32,
                               minval=-initrange, maxval=initrange)

    center_words = jax.random.randint(k3, (batch, 1), 0, vocab_size, dtype=jnp.int32)
    target_words = jax.random.randint(k4, (batch, 1), 0, vocab_size, dtype=jnp.int32)
    outer_words = jax.random.randint(k5, (batch, num_outer), 0, vocab_size, dtype=jnp.int32)

    nll = skipgram_forward(emb_v, emb_u, center_words, target_words, outer_words)
    nll = jax.block_until_ready(nll)

    ref = reference_forward(emb_v, emb_u, center_words, target_words, outer_words)
    assert jnp.allclose(nll, ref, rtol=1e-4, atol=2e-5), (nll, ref)

    print("KERNEL_OK")
</pallas_src>

<mosaic_0001>
module attributes {stable_mosaic.version = 11 : i64} {
  func.func @skipgram_logp_kernel(%arg0: i32, %arg1: memref<8x128xf32, #tpu.memory_space<vmem>>, %arg2: memref<8x1xi32, #tpu.memory_space<vmem>>, %arg3: memref<8x8xi32, #tpu.memory_space<vmem>>, %arg4: memref<128x64xf32, #tpu.memory_space<vmem>>, %arg5: memref<8x128xf32, #tpu.memory_space<vmem>>) attributes {dimension_semantics = [#tpu.dimension_semantics<parallel>], iteration_bounds = array<i64: 2>, scalar_prefetch = 0 : i64, scratch_operands = 0 : i64, tpu.core_type = #tpu.core_type<tc>, window_params = [{transform_indices = @transform_0, window_bounds = array<i64: 8, 128>}, {transform_indices = @transform_1, window_bounds = array<i64: 8, 1>}, {transform_indices = @transform_2, window_bounds = array<i64: 8, 8>}, {pipeline_mode = #tpu.pipeline_mode<synchronous>, transform_indices = @transform_3, window_bounds = array<i64: 128, 64>}, {transform_indices = @transform_4, window_bounds = array<i64: 8, 128>}]} {
    %c0 = arith.constant 0 : index
    %c0_0 = arith.constant 0 : index
    %0 = vector.load %arg1[%c0, %c0_0] : memref<8x128xf32, #tpu.memory_space<vmem>>, vector<8x128xf32>
    %c0_1 = arith.constant 0 : index
    %c0_2 = arith.constant 0 : index
    %1 = vector.load %arg4[%c0_1, %c0_2] : memref<128x64xf32, #tpu.memory_space<vmem>>, vector<128x64xf32>
    %cst = arith.constant dense<0.000000e+00> : vector<8x64xf32>
    %2 = tpu.matmul %0, %1, %cst {dimension_numbers = #tpu.dot_dimension_numbers<[1], [0], [0], [1], [0, 0, 1, 1], [], []>} : vector<8x128xf32>, vector<128x64xf32>, vector<8x64xf32> -> vector<8x64xf32>
    %3 = tpu.iota {dimensions = array<i32: 1>} : vector<8x64xi32>
    %c0_3 = arith.constant 0 : index
    %c0_4 = arith.constant 0 : index
    %4 = vector.load %arg2[%c0_3, %c0_4] : memref<8x1xi32, #tpu.memory_space<vmem>>, vector<8x1xi32>
    %5 = vector.broadcast %4 : vector<8x1xi32> to vector<8x64xi32>
    %6 = arith.cmpi eq, %3, %5 : vector<8x64xi32>
    %7 = arith.extui %6 : vector<8x64xi1> to vector<8x64xi32>
    %8 = arith.sitofp %7 : vector<8x64xi32> to vector<8x64xf32>
    %9 = arith.mulf %8, %2 : vector<8x64xf32>
    %cst_5 = arith.constant dense<0.000000e+00> : vector<8xf32>
    %10 = vector.multi_reduction <add>, %9, %cst_5 [1] : vector<8x64xf32> to vector<8xf32>
    %11 = vector.shape_cast %10 : vector<8xf32> to vector<8x1xf32>
    %c0_6 = arith.constant 0 : index
    %c0_7 = arith.constant 0 : index
    %12 = vector.load %arg3[%c0_6, %c0_7] : memref<8x8xi32, #tpu.memory_space<vmem>>, vector<8x8xi32>
    %cst_8 = arith.constant 0.000000e+00 : f32
    %13 = vector.broadcast %cst_8 : f32 to vector<8x64xf32>
    %14 = vector.extract_strided_slice %12 {offsets = [0, 0], sizes = [8, 1], strides = [1, 1]} : vector<8x8xi32> to vector<8x1xi32>
    %15 = vector.broadcast %14 : vector<8x1xi32> to vector<8x64xi32>
    %16 = arith.cmpi eq, %3, %15 : vector<8x64xi32>
    %17 = arith.extui %16 : vector<8x64xi1> to vector<8x64xi32>
    %18 = arith.sitofp %17 : vector<8x64xi32> to vector<8x64xf32>
    %19 = arith.addf %13, %18 : vector<8x64xf32>
    %20 = vector.extract_strided_slice %12 {offsets = [0, 1], sizes = [8, 1], strides = [1, 1]} : vector<8x8xi32> to vector<8x1xi32>
    %21 = vector.broadcast %20 : vector<8x1xi32> to vector<8x64xi32>
    %22 = arith.cmpi eq, %3, %21 : vector<8x64xi32>
    %23 = arith.extui %22 : vector<8x64xi1> to vector<8x64xi32>
    %24 = arith.sitofp %23 : vector<8x64xi32> to vector<8x64xf32>
    %25 = arith.addf %19, %24 : vector<8x64xf32>
    %26 = vector.extract_strided_slice %12 {offsets = [0, 2], sizes = [8, 1], strides = [1, 1]} : vector<8x8xi32> to vector<8x1xi32>
    %27 = vector.broadcast %26 : vector<8x1xi32> to vector<8x64xi32>
    %28 = arith.cmpi eq, %3, %27 : vector<8x64xi32>
    %29 = arith.extui %28 : vector<8x64xi1> to vector<8x64xi32>
    %30 = arith.sitofp %29 : vector<8x64xi32> to vector<8x64xf32>
    %31 = arith.addf %25, %30 : vector<8x64xf32>
    %32 = vector.extract_strided_slice %12 {offsets = [0, 3], sizes = [8, 1], strides = [1, 1]} : vector<8x8xi32> to vector<8x1xi32>
    %33 = vector.broadcast %32 : vector<8x1xi32> to vector<8x64xi32>
    %34 = arith.cmpi eq, %3, %33 : vector<8x64xi32>
    %35 = arith.extui %34 : vector<8x64xi1> to vector<8x64xi32>
    %36 = arith.sitofp %35 : vector<8x64xi32> to vector<8x64xf32>
    %37 = arith.addf %31, %36 : vector<8x64xf32>
    %38 = vector.extract_strided_slice %12 {offsets = [0, 4], sizes = [8, 1], strides = [1, 1]} : vector<8x8xi32> to vector<8x1xi32>
    %39 = vector.broadcast %38 : vector<8x1xi32> to vector<8x64xi32>
    %40 = arith.cmpi eq, %3, %39 : vector<8x64xi32>
    %41 = arith.extui %40 : vector<8x64xi1> to vector<8x64xi32>
    %42 = arith.sitofp %41 : vector<8x64xi32> to vector<8x64xf32>
    %43 = arith.addf %37, %42 : vector<8x64xf32>
    %44 = vector.extract_strided_slice %12 {offsets = [0, 5], sizes = [8, 1], strides = [1, 1]} : vector<8x8xi32> to vector<8x1xi32>
    %45 = vector.broadcast %44 : vector<8x1xi32> to vector<8x64xi32>
    %46 = arith.cmpi eq, %3, %45 : vector<8x64xi32>
    %47 = arith.extui %46 : vector<8x64xi1> to vector<8x64xi32>
    %48 = arith.sitofp %47 : vector<8x64xi32> to vector<8x64xf32>
    %49 = arith.addf %43, %48 : vector<8x64xf32>
    %50 = vector.extract_strided_slice %12 {offsets = [0, 6], sizes = [8, 1], strides = [1, 1]} : vector<8x8xi32> to vector<8x1xi32>
    %51 = vector.broadcast %50 : vector<8x1xi32> to vector<8x64xi32>
    %52 = arith.cmpi eq, %3, %51 : vector<8x64xi32>
    %53 = arith.extui %52 : vector<8x64xi1> to vector<8x64xi32>
    %54 = arith.sitofp %53 : vector<8x64xi32> to vector<8x64xf32>
    %55 = arith.addf %49, %54 : vector<8x64xf32>
    %56 = vector.extract_strided_slice %12 {offsets = [0, 7], sizes = [8, 1], strides = [1, 1]} : vector<8x8xi32> to vector<8x1xi32>
    %57 = vector.broadcast %56 : vector<8x1xi32> to vector<8x64xi32>
    %58 = arith.cmpi eq, %3, %57 : vector<8x64xi32>
    %59 = arith.extui %58 : vector<8x64xi1> to vector<8x64xi32>
    %60 = arith.sitofp %59 : vector<8x64xi32> to vector<8x64xf32>
    %61 = arith.addf %55, %60 : vector<8x64xf32>
    %cst_9 = arith.constant 0.000000e+00 : f32
    %62 = vector.broadcast %cst_9 : f32 to vector<8x64xf32>
    %63 = arith.cmpf ogt, %61, %62 : vector<8x64xf32>
    %cst_10 = arith.constant 0xFF800000 : f32
    %64 = vector.broadcast %cst_10 : f32 to vector<8x64xf32>
    %65 = arith.select %63, %2, %64 : vector<8x64xi1>, vector<8x64xf32>
    %cst_11 = arith.constant dense<0xFF800000> : vector<8xf32>
    %66 = vector.multi_reduction <maximumf>, %65, %cst_11 [1] : vector<8x64xf32> to vector<8xf32>
    %67 = vector.shape_cast %66 : vector<8xf32> to vector<8x1xf32>
    %68 = vector.broadcast %67 : vector<8x1xf32> to vector<8x64xf32>
    %69 = arith.subf %65, %68 : vector<8x64xf32>
    %70 = math.exp %69 : vector<8x64xf32>
    %71 = arith.mulf %61, %70 : vector<8x64xf32>
    %cst_12 = arith.constant dense<0.000000e+00> : vector<8xf32>
    %72 = vector.multi_reduction <add>, %71, %cst_12 [1] : vector<8x64xf32> to vector<8xf32>
    %73 = vector.shape_cast %72 : vector<8xf32> to vector<8x1xf32>
    %74 = math.log %73 : vector<8x1xf32>
    %75 = arith.addf %67, %74 : vector<8x1xf32>
    %76 = arith.subf %11, %75 : vector<8x1xf32>
    %77 = vector.shape_cast %76 : vector<8x1xf32> to vector<8x1xf32>
    %78 = vector.broadcast %77 : vector<8x1xf32> to vector<8x128xf32>
    %c0_13 = arith.constant 0 : index
    %c0_14 = arith.constant 0 : index
    %79 = vector.load %arg5[%c0_13, %c0_14] : memref<8x128xf32, #tpu.memory_space<vmem>>, vector<8x128xf32>
    tpu.vector_store %arg5[%c0_13, %c0_14], %78 {strides = array<i32>} : memref<8x128xf32, #tpu.memory_space<vmem>>, vector<8x128xf32>,
    return
  }
  func.func @transform_0(%arg0: i32) -> (i32, i32) {
    %c0_i32 = arith.constant 0 : i32
    %c0_i32_0 = arith.constant 0 : i32
    return %arg0, %c0_i32 : i32, i32
  }
  func.func @transform_1(%arg0: i32) -> (i32, i32) {
    %c0_i32 = arith.constant 0 : i32
    %c0_i32_0 = arith.constant 0 : i32
    return %arg0, %c0_i32 : i32, i32
  }
  func.func @transform_2(%arg0: i32) -> (i32, i32) {
    %c0_i32 = arith.constant 0 : i32
    %c0_i32_0 = arith.constant 0 : i32
    return %arg0, %c0_i32 : i32, i32
  }
  func.func @transform_3(%arg0: i32) -> (i32, i32) {
    %c0_i32 = arith.constant 0 : i32
    %c0_i32_0 = arith.constant 0 : i32
    %c0_i32_1 = arith.constant 0 : i32
    return %c0_i32, %c0_i32_0 : i32, i32
  }
  func.func @transform_4(%arg0: i32) -> (i32, i32) {
    %c0_i32 = arith.constant 0 : i32
    %c0_i32_0 = arith.constant 0 : i32
    return %arg0, %c0_i32 : i32, i32
  }
}

</mosaic_0001>

<bundles_post_ra>
// kernel: tpu_custom_call.1
= control target key start
LH: loop header
LB: loop body
LE: loop exit
PB: predicated region body
PF: predicated region fallthrough
CT: control target
= control target key end

     0   :  { %9 = vsyncpa [#allocation3], 0  ;;  %s943_s0 = inlined_call_operand.vmem [shape: f32[16,128], index: 0, kind: input, shape index: {}]   ;;  %s944_s1 = inlined_call_operand.vmem [shape: s32[16,1], index: 1, kind: input, shape index: {}]   ;;  %s945_s2 = inlined_call_operand.vmem [shape: s32[16,8], index: 2, kind: input, shape index: {}]   ;;  %s946_s3 = inlined_call_operand.vmem [shape: f32[128,64], index: 3, kind: input, shape index: {}]   ;;  %s947_s4 = inlined_call_operand.hbm [shape: f32[16,128], index: 4, kind: output, shape index: {}]  }
   0x1   :  { %11 = vsyncpa [#allocation3 + $0x1], 0  ;;  %s761_s15 = smov 0   ;;  %s763_s16 = smov 0  }
   0x2   :  { %s765_s17 = smov 0   ;;  %s767_s18 = smov 0  }
   0x3 LB: > { %s782_s19 = sadd.s32 4294967295, %s722_s18   ;;  %s499_s20 = sadd.s32 4294967294, %s722_s18   ;;  %s722_s18 = sphi %s767_s18, %s953_s18   ;;  %s718_s17 = sphi %s765_s17, %s952_s17   ;;  %s714_s16 = sphi %s763_s16, %s951_s16   ;;  %s710_s15 = sphi %s761_s15, %s950_s15  }
   0x4   : > { %s786_s21 = sadd.s32 1, %s722_s18   ;;  %s123_s22 = sadd.s32 1, %s718_s17 }
   0x5   : > { %s120_s23 = ssub.s32 %s722_s18, %s786_s21  ;;  %p133_p0 = scmp.ne.s32.totalorder %s718_s17, %s714_s16 }
   0x6   : > { %p121_p1 = scmp.eq.s32.totalorder %s120_s23, 0  ;;  %p134_p2 = scmp.eq.s32.totalorder %s782_s19, 1 }
   0x7   : > { %p139_p3 = scmp.ne.s32.totalorder %s714_s16, %s710_s15  ;;  %p140_p4 = scmp.eq.s32.totalorder %s499_s20, 1 }
   0x8   : > { %s797_s24 = scalar_select %p121_p1, %s718_s17, %s123_s22  }
   0x9   : > { %p799_p5 = por %p134_p2, %p133_p0  ;;  %p803_p6 = por %p140_p4, %p139_p3 }
   0xa   : > { %p502_p7 = scmp.ge.s32.totalorder %s722_s18, 1  ;;  %p182_p8 = scmp.lt.s32.totalorder %s722_s18, 3 }
   0xc   : > { %p183_p9 = pnand %p502_p7, %p182_p8 }
   0xd   : > { %v228_v0 = vld [vmem:[%s946_s3] sm:$0xff] (!%p183_p9)  ;;  %v229_v1 = vld [vmem:[%s946_s3 + $0x8] sm:$0xff] (!%p183_p9)  ;;  %v230_v2 = vld [vmem:[%s946_s3 + $0x10] sm:$0xff] (!%p183_p9)  ;;  %v724_v3 = vmov (!%p183_p9), 0.0|0.0   ;;  %vm725_vm0 = vmmov (!%p183_p9), 0   ;;  %v726_v6 = vmov (!%p183_p9), 0.0   ;;  %v314_v38 = vlaneseq (!%p183_p9) }
   0xe   : > { %186 = sbr.rel (%p183_p9) target bundleno = 595 (0x253), region = 36  ;;  %572 = vmatprep.subr.bf16.mxu0 (!%p183_p9), %v724_v3  ;;  %v573_v4 = vpack.c.bf16 (!%p183_p9), %v229_v1, %v228_v0  ;;  %v231_v5 = vld [vmem:[%s946_s3 + $0x18] sm:$0xff] (!%p183_p9)  ;;  %569 = vmatprep.mubr.msk.f32.mxu0 (!%p183_p9), %vm725_vm0, %v726_v6  ;;  %p215_p10 = scmp.lt.s32.totalorder (!%p183_p9), %s782_s19, 1  ;;  %v727_v7 = vmov (!%p183_p9), 2   ;;  %v728_v8 = vmov (!%p183_p9), 0   ;;  %v232_v10 = vld [vmem:[%s946_s3 + $0x20] sm:$0xff] (!%p183_p9) }
   0xf   : > { %648 = vset.pattern.permute.xlu1 (!%p183_p9), %v727_v7  ;;  %646 = vset.pattern.permute.xlu0 (!%p183_p9), %v728_v8  ;;  %v576_v9 = vpack.c.bf16 (!%p183_p9), %v231_v5, %v230_v2  ;;  %v233_v11 = vld [vmem:[%s946_s3 + $0x28] sm:$0xff] (!%p183_p9)  ;;  %v234_v14 = vld [vmem:[%s946_s3 + $0x30] sm:$0xff] (!%p183_p9)  ;;  %v235_v15 = vld [vmem:[%s946_s3 + $0x38] sm:$0xff] (!%p183_p9)  ;;  %v729_v19 = vmov (!%p183_p9), 3   ;;  %v730_v20 = vmov (!%p183_p9), 1   ;;  %v731_v24 = vmov (!%p183_p9), 4  }
  0x10   : > { %574 = vmatpush3.bf16.msra.mxu0 (!%p183_p9), %v573_v4  ;;  %v579_v12 = vpack.c.bf16 (!%p183_p9), %v233_v11, %v232_v10  ;;  %v582_v16 = vpack.c.bf16 (!%p183_p9), %v235_v15, %v234_v14  ;;  %v236_v17 = vld [vmem:[%s946_s3 + $0x40] sm:$0xff] (!%p183_p9)  ;;  %v237_v18 = vld [vmem:[%s946_s3 + $0x48] sm:$0xff] (!%p183_p9)  ;;  %v238_v22 = vld [vmem:[%s946_s3 + $0x50] sm:$0xff] (!%p183_p9)  ;;  %v732_v25 = vmov (!%p183_p9), 5   ;;  %v733_v29 = vmov (!%p183_p9), 6   ;;  %s517_s12 = sshll.u32 (!%p183_p9), %s782_s19, 7 }
  0x11   : > { %575 = vmatprep.subr.bf16.mxu0 (!%p183_p9), %v724_v3  ;;  %v585_v21 = vpack.c.bf16 (!%p183_p9), %v237_v18, %v236_v17  ;;  %v239_v23 = vld [vmem:[%s946_s3 + $0x58] sm:$0xff] (!%p183_p9)  ;;  %v240_v27 = vld [vmem:[%s946_s3 + $0x60] sm:$0xff] (!%p183_p9)  ;;  %v241_v28 = vld [vmem:[%s946_s3 + $0x68] sm:$0xff] (!%p183_p9)  ;;  %v734_v33 = vmov (!%p183_p9), 7   ;;  %v315_v39 = vand.u32 (!%p183_p9), 127, %v314_v38  ;;  %vm324_vm10 = vcmask (!%p183_p9), 523264   ;;  %s901_s27 = scalar_lea.hbm (!%p183_p9), %s947_s4, %s517_s12 }
  0x12   : > { %v588_v26 = vpack.c.bf16 (!%p183_p9), %v239_v23, %v238_v22  ;;  %v591_v30 = vpack.c.bf16 (!%p183_p9), %v241_v28, %v240_v27  ;;  %v242_v31 = vld [vmem:[%s946_s3 + $0x70] sm:$0xff] (!%p183_p9)  ;;  %v243_v32 = vld [vmem:[%s946_s3 + $0x78] sm:$0xff] (!%p183_p9) }
  0x13   : > { %v594_v34 = vpack.c.bf16 (!%p183_p9), %v243_v32, %v242_v31 }
  0x14   : > { %577 = vmatpush3.bf16.msra.mxu0 (!%p183_p9), %v576_v9 }
  0x15   : > { %s216_s9 = scalar_select %p215_p10, %s782_s19, 1  ;;  %578 = vmatprep.subr.bf16.mxu0 %v724_v3 }
  0x16   : > { %s735_s19 = smov [#allocation2]  }
  0x17   : > { %s833_s14 = sshll.u32 %s216_s9, 3  ;;  %s664_s30 = sshll.u32 %s735_s19, 4  ;;  %s665_s30 = int_to_ptr.vmem [resolvable:$false] %s664_s30 }
  0x18   : > { %s226_s23 = scalar_lea.vmem %s945_s2, %s833_s14  ;;  %580 = vmatpush3.bf16.msra.mxu0 %v579_v12  ;;  %s222_s7 = scalar_lea.vmem %s944_s1, %s833_s14 }
  0x19   : > { %v328_v13 = vld [vmem:[%s226_s23] sm:$0xff]  ;;  %581 = vmatprep.subr.bf16.mxu0 %v724_v3  ;;  %s218_s10 = scalar_lea.vmem %s943_s0, %s833_s14  ;;  %s212_s14 = sand.u32 1, %s714_s16  }
  0x1a   : > { %344 = vperm.xlu1 %648, %v328_v13   ;;  %330 = vperm.xlu0 %646, %v328_v13   ;;  %v316_v35 = vld [vmem:[%s222_s7] sm:$0xff]  ;;  %s503_s11 = sshll.u32 %s212_s14, 3  ;;  %s403_s28 = scalar_lea.sflag [#allocation3], %s212_s14 }
  0x1b   : > { %v227_v36 = vld [vmem:[%s218_s10] sm:$0xff]  ;;  %s214_s13 = scalar_lea.vmem [#allocation2], %s503_s11  ;;  %s666_s5 = scalar_lea.vmem %s665_s30, 256 }
  0x1c   : > { %583 = vmatpush3.bf16.msra.mxu0 %v582_v16  ;;  %s416_s20 = sshll.u32 %s214_s13, 4  ;;  %s903_s20 = int_to_ptr.vmem [resolvable:$true] %s416_s20 }
  0x1d   : > { %584 = vmatprep.subr.bf16.mxu0 %v724_v3  ;;  %s660_s29 = scalar_lea.vmem %s903_s20, 128  ;;  %p667_p0 = scmp.lt.s32.totalorder %s903_s20, %s665_s30 }
  0x1e   : > { %649 = vset.pattern.permute.xlu1 %v729_v19  ;;  %647 = vset.pattern.permute.xlu0 %v730_v20  ;;  %p661_p11 = scmp.ne.s32.totalorder %s903_s20, %s660_s29  ;;  %p668_p1 = scmp.lt.s32.totalorder %s666_s5, %s660_s29 }
  0x1f   : > { %351 = vperm.xlu1 %649, %v328_v13   ;;  %337 = vperm.xlu0 %647, %v328_v13  }
  0x20   : > { %586 = vmatpush3.bf16.msra.mxu0 %v585_v21  ;;  %p662_p12 = pnand %p661_p11, %p799_p5  ;;  %p669_p2 = por %p668_p1, %p667_p0 }
  0x21   : > { %587 = vmatprep.subr.bf16.mxu0 %v724_v3 }
  0x22   : > { %p663_p13 = pneg %p662_p12 }
  0x23   : > { %650 = vset.pattern.permute.xlu1 %v731_v24  ;;  %651 = vset.pattern.permute.xlu0 %v732_v25 }
  0x24   : > { %358 = vperm.xlu1 %650, %v328_v13   ;;  %365 = vperm.xlu0 %651, %v328_v13   ;;  %p670_p3 = pnand %p669_p2, %p663_p13 }
  0x25   : > { %589 = vmatpush3.bf16.msra.mxu0 %v588_v26 }
  0x26   : > { %590 = vmatprep.subr.bf16.mxu0 %v724_v3 }
  0x28   : > { %652 = vset.pattern.permute.xlu1 %v733_v29  ;;  %655 = vset.pattern.permute.xlu0 %v734_v33 }
  0x29   : > { %372 = vperm.xlu1 %652, %v328_v13   ;;  %592 = vmatpush3.bf16.msra.mxu0 %v591_v30 }
  0x2a   : > { %593 = vmatprep.subr.bf16.mxu0 %v724_v3 }
  0x2d   : > { %653 = vset.pattern.permute.xlu1 %v734_v33  ;;  %595 = vmatpush3.bf16.msra.mxu0 %v594_v34 }
  0x2e   : > { %379 = vperm.xlu1 %653, %v328_v13  }
  0x30   : > { %570 = vmatmul.mubr.f32.vlgmr.msra.gmra.mrb[0].mxu0 %v227_v36 }
  0x32   : > { %654 = vset.pattern.permute.xlu1 %v728_v8 }
  0x33   : > { %318 = vperm.xlu1 %654, %v316_v35  }
  0x99   : > { %v331_v37 = vpop.permute.xlu0 %330  ;;  %v345_v40 = vpop.permute.xlu1 %344 }
  0x9a   : > { %vm332_vm1 = vcmp.eq.s32.totalorder %v315_v39, %v331_v37  ;;  %vm346_vm3 = vcmp.eq.s32.totalorder %v315_v39, %v345_v40 }
  0x9b   : > { %v508_v42 = vsel %vm332_vm1, 1.0, %v726_v6  ;;  %v510_v46 = vsel %vm346_vm3, 1.0, %v726_v6 }
  0x9e   : > { %v338_v41 = vpop.permute.xlu0 %337  ;;  %v352_v43 = vpop.permute.xlu1 %351 }
  0x9f   : > { %vm339_vm2 = vcmp.eq.s32.totalorder %v315_v39, %v338_v41  ;;  %vm353_vm4 = vcmp.eq.s32.totalorder %v315_v39, %v352_v43 }
  0xa0   : > { %v509_v44 = vsel %vm339_vm2, 1.0, %v726_v6  ;;  %v511_v49 = vsel %vm353_vm4, 1.0, %v726_v6 }
  0xa1   : > { %v342_v45 = vadd.f32 %v509_v44, %v508_v42 }
  0xa3   : > { %v359_v47 = vpop.permute.xlu1 %358  ;;  %v349_v48 = vadd.f32 %v510_v46, %v342_v45  ;;  %v366_v50 = vpop.permute.xlu0 %365 }
  0xa4   : > { %vm360_vm5 = vcmp.eq.s32.totalorder %v315_v39, %v359_v47  ;;  %vm367_vm6 = vcmp.eq.s32.totalorder %v315_v39, %v366_v50 }
  0xa5   : > { %v356_v51 = vadd.f32 %v511_v49, %v349_v48  ;;  %v512_v52 = vsel %vm360_vm5, 1.0, %v726_v6  ;;  %v513_v55 = vsel %vm367_vm6, 1.0, %v726_v6 }
  0xa7   : > { %v363_v54 = vadd.f32 %v512_v52, %v356_v51 }
  0xa8   : > { %v373_v53 = vpop.permute.xlu1 %372 }
  0xa9   : > { %vm374_vm7 = vcmp.eq.s32.totalorder %v315_v39, %v373_v53  ;;  %v370_v57 = vadd.f32 %v513_v55, %v363_v54 }
  0xaa   : > { %v514_v58 = vsel %vm374_vm7, 1.0, %v726_v6 }
  0xab   : > { %v377_v59 = vadd.f32 %v514_v58, %v370_v57 }
  0xad   : > { %v380_v56 = vpop.permute.xlu1 %379 }
  0xae   : > { %vm381_vm8 = vcmp.eq.s32.totalorder %v315_v39, %v380_v56 }
  0xaf   : > { %v515_v60 = vsel %vm381_vm8, 1.0, %v726_v6 }
  0xb0   : > { %v384_v62 = vadd.f32 %v515_v60, %v377_v59 }
  0xb2   : > { %v319_v61 = vpop.permute.xlu1 %318  ;;  %vm385_vm11 = vcmp.gt.f32.partialorder %v384_v62, 0.0 }
  0xb3   : > { %vm320_vm9 = vcmp.eq.s32.totalorder %v315_v39, %v319_v61 }
  0xb4   : > { %v507_v63 = vsel %vm320_vm9, 1.0, %v726_v6 }
 0x103   : > { %v310_v0 = vpop.f32.mrb[0].mxu0 }
 0x104   : > { %v571_v1 = vpop.f32.mrb[1].mxu0  ;;  %v386_v2 = vsel %vm385_vm11, %v310_v0, -inf  ;;  %v323_v3 = vmul.f32 %v507_v63, %v310_v0 }
 0x105   : > { %v387_v4 = vsel %vm324_vm10, %v386_v2, -inf }
 0x106   : > { %388 = vmax.xlane.f32.xlu0 %v387_v4  ;;  %v325_v5 = vsel %vm324_vm10, %v323_v3, 0.0 }
 0x10a   : > { %326 = vadd.xlane.f32.xlu0 %v325_v5 }
 0x193   : > { %v389_v7 = vpop.xlane.xlu0 %388 }
 0x194   : > { %v390_v8 = vsub.f32 %v386_v2, %v389_v7 }
 0x196   : > { %v391_v9 = vmul.f32 1.442695, %v390_v8 }
 0x197   : > { %v327_v16 = vpop.xlane.xlu0 %326 }
 0x198   : > { %656 = vpow2.f32 %v391_v9 }
 0x1a2   : > { %v657_v10 = vpop.eup %656 }
 0x1a3   : > { %v393_v6 = vmul.f32 %v657_v10, %v384_v62 }
 0x1a5   : > { %v394_v11 = vsel %vm324_vm10, %v393_v6, 0.0 }
 0x1a6   : > { %395 = vadd.xlane.f32.xlu1 %v394_v11 }
 0x233   : > { %v396_v12 = vpop.xlane.xlu1 %395 }
 0x234   : > { %658 = vlog2.f32 %v396_v12 }
 0x23e   : > { %v659_v13 = vpop.eup %658 }
 0x23f   : > { %v398_v14 = vmul.f32 0.6931472, %v659_v13 }
 0x241   : > { %v399_v15 = vadd.f32 %v398_v14, %v389_v7 }
 0x243   : > { %v400_v17 = vsub.f32 %v327_v16, %v399_v15 }
 0x245   : > { %401 = vst [vmem:[%s214_s13] sm:$0xff] %v400_v17 }
 0x246   : > { %673 = shalt.err (!%p670_p3)
}
 0x247   : > { %s674_s6 = scalar_lea.hbm %s901_s27, 128  ;;  %s678_s9 = scalar_lea.hbm %s947_s4, 256 }
 0x248   : > { %p675_p4 = scmp.ne.s32.totalorder %s901_s27, %s674_s6  ;;  %p679_p9 = scmp.lt.u32.totalorder %s901_s27, %s947_s4 }
 0x249   : > { %p680_p10 = scmp.lt.u32.totalorder %s678_s9, %s674_s6  ;;  %p682_p12 = scmp.lt.u32.totalorder %s674_s6, %s901_s27 }
 0x24a   : > { %p676_p7 = pnand %p675_p4, %p799_p5 }
 0x24b   : > { %p681_p11 = por %p680_p10, %p679_p9 }
 0x24c   : > { %p677_p8 = pneg %p676_p7 }
 0x24d   : > { %p683_p13 = por %p682_p12, %p681_p11 }
 0x24f   : > { %p684_p0 = pnand %p683_p13, %p677_p8 }
 0x251   : > { %687 = shalt.err (!%p684_p0)
}
 0x252   : > { %596 = dma.vmem_to_hbm [thread:$0]  (%p799_p5), %s903_s20, 128, %s901_s27, %s403_s28  }
 0x253 PF: > { %p602_p1 = scmp.ge.s32.totalorder %s722_s18, 2  ;;  %s428_s11 = sand.u32 1, %s710_s15  }
 0x254   : > { %s429_s12 = scalar_lea.sflag [#allocation3], %s428_s11 }
 0x255   : > { %p599_p2 = pnand %p602_p1, %p803_p6 }
 0x257   : > { %705 = dma.done.wait (!%p599_p2), %s429_s12, 128  }
 0x258   : > { %707 = vsyncadd (!%p599_p2), %s429_s12, 4294967168  ;;  %p14_p3 = scmp.ge.s32.totalorder %s786_s21, 4   ;;  %s950_s15 = smov %s714_s16 }
 0x259   : > { %s951_s16 = smov %s718_s17  ;;  %s952_s17 = smov %s797_s24 }
 0x25a   : > { %s953_s18 = smov %s786_s21  ;;  %16 = sbr.rel (!%p14_p3) target bundleno = 3 (0x3), region = 77 }
 0x261   :  { %434 = vsyncpa [#allocation3], 1 }
 0x262   :  { %436 = vsyncpa [#allocation3 + $0x1], 1 }

</bundles_post_ra>
